<compile_context>
chip_gen: v7x
topology: tpu7x:2x2x1
jax: 0.10.0
libtpu: 0.0.40
codegen_flags: <defaults>
</compile_context>

<pallas_src>
import functools

import jax
import jax.numpy as jnp
from jax.experimental import pallas as pl
from jax.experimental.pallas import tpu as pltpu

LANES = 128
NUM_PARTITIONS = 2   # leading grid axis; uses both TensorCores on v7x


def _round_up(a, b):
    return (a + b - 1) // b * b


def _device_is_v7():
    try:
        return "v7" in jax.devices()[0].device_kind.lower()
    except Exception:
        return False


_IS_V7 = _device_is_v7()


def _pick_chunk(block_rows):
    """Row sub-chunk for the in-kernel accumulating loop.

    Largest multiple-of-8 divisor of block_rows not exceeding
    max(512, block_rows // 8): power-of-two blocks get ~8 unrolled chunks;
    awkward factorizations fall back to whole-block processing.
    """
    cap = max(512, block_rows // 8)
    best = 8
    c = 8
    while c <= min(block_rows, cap):
        if block_rows % c == 0:
            best = c
        c += 8
    if block_rows // best > 32:   # pathological factorization -> whole block
        best = block_rows
    return best


def _dice_bce_kernel(x_ref, t_ref, out_ref, *, rows, block_rows, jblocks,
                     chunk, unroll):
    """Fold one (block_rows, 128) block of p/t into three (8,128) partials:
       [un-negated BCE sum, sum(p*t), sum(p)+sum(t)]."""
    p = pl.program_id(0)
    j = pl.program_id(1)

    @pl.when(j == 0)
    def _init():
        out_ref[...] = jnp.zeros_like(out_ref)

    blk = p * jblocks + j            # logical (unclamped) block index
    row0 = blk * block_rows
    n_chunks = block_rows // chunk

    def accumulate(masked):
        def body(i, carry):
            acc_bce, acc_int, acc_sum = carry
            r = pl.multiple_of(i * chunk, chunk)
            x = x_ref[pl.ds(r, chunk), :].astype(jnp.float32)
            t = t_ref[pl.ds(r, chunk), :].astype(jnp.float32)
            if masked:
                # Row-granular mask only; lane-tail pad zeros already
                # contribute 0 to every sum.
                rid = row0 + i * chunk + jax.lax.broadcasted_iota(
                    jnp.int32, (chunk, LANES), 0)
                valid = rid < rows
                x = jnp.where(valid, x, 0.0)
                t = jnp.where(valid, t, 0.0)

            # torch.nn.BCELoss clamps the log terms at -100; this also makes
            # masked (x=0, t=0) elements contribute exactly 0.
            log_x = jnp.maximum(jnp.log(x), -100.0)
            log_1mx = jnp.maximum(jnp.log1p(-x), -100.0)
            bce = log_1mx + t * (log_x - log_1mx)   # un-negated BCE term

            def fold(v):   # (chunk,128) -> (8,128): pure VPU sublane folds
                return v.reshape(chunk // 8, 8, LANES).sum(axis=0)

            return (acc_bce + fold(bce),
                    acc_int + fold(x * t),
                    acc_sum + fold(x + t))

        zero = jnp.zeros((8, LANES), jnp.float32)
        acc_bce, acc_int, acc_sum = jax.lax.fori_loop(
            0, n_chunks, body, (zero, zero, zero), unroll=unroll)
        out_ref[0, 0] += acc_bce
        out_ref[0, 1] += acc_int
        out_ref[0, 2] += acc_sum

    is_full = (row0 + block_rows) <= rows

    @pl.when(is_full)
    def _fast_path():          # common case: no mask work at all
        accumulate(masked=False)

    @pl.when(jnp.logical_not(is_full))
    def _tail_path():          # ragged tail / clamped out-of-range blocks
        accumulate(masked=True)


def _to_slab(a):
    """Flatten to (rows, 128) in native dtype. Pads only when n % 128 != 0."""
    flat = a.reshape(-1)
    n = flat.shape[0]
    rem = (-n) % LANES
    if rem:
        flat = jnp.pad(flat, (0, rem))
    return flat.reshape(-1, LANES), n


@functools.partial(
    jax.jit,
    static_argnames=("bce_weight", "dice_weight", "smooth",
                     "core_parallel", "is_v7"))
def _dice_bce_impl(pred, target, *, bce_weight, dice_weight, smooth,
                   core_parallel, is_v7):
    x2d, n = _to_slab(pred)
    t2d, _ = _to_slab(target)
    rows = x2d.shape[0]

    # Dtype- and chip-aware block size: ~2 MiB per input block on v7x (64 MiB
    # VMEM / TC), ~4 MiB on v5e/v6e (128 MiB VMEM).
    itemsize = jnp.dtype(pred.dtype).itemsize
    target_block_bytes = (2 if is_v7 else 4) * 1024 * 1024
    block_rows_max = max(512, (target_block_bytes // (LANES * itemsize))
                         // 512 * 512)
    block_rows = min(block_rows_max, _round_up(rows, 8))
    chunk = _pick_chunk(block_rows)
    unroll = (block_rows // chunk) <= 8

    total_blocks = pl.cdiv(rows, block_rows)
    num_parts = min(NUM_PARTITIONS, total_blocks)
    jblocks = pl.cdiv(total_blocks, num_parts)
    max_blk = total_blocks - 1

    def in_map(p, j):
        # Clamp so DMA never targets a block past the array; the kernel's
        # logical-index tail path zeroes any such block's contribution.
        return (jnp.minimum(p * jblocks + j, max_blk), 0)

    if (core_parallel and num_parts == NUM_PARTITIONS
            and hasattr(pltpu, "CORE_PARALLEL")):
        semantics = (pltpu.CORE_PARALLEL, pltpu.ARBITRARY)  # real cross-TC split
    else:
        semantics = ("parallel", "arbitrary")

    partials = pl.pallas_call(
        functools.partial(_dice_bce_kernel, rows=rows, block_rows=block_rows,
                          jblocks=jblocks, chunk=chunk, unroll=unroll),
        out_shape=jax.ShapeDtypeStruct((num_parts, 3, 8, LANES), jnp.float32),
        grid_spec=pltpu.PrefetchScalarGridSpec(
            num_scalar_prefetch=0,
            grid=(num_parts, jblocks),
            in_specs=[
                pl.BlockSpec((block_rows, LANES), in_map),
                pl.BlockSpec((block_rows, LANES), in_map),
            ],
            # Per-partition resident vector accumulator; reduced once in glue.
            out_specs=pl.BlockSpec((1, 3, 8, LANES), lambda p, j: (p, 0, 0, 0)),
        ),
        compiler_params=pltpu.CompilerParams(
            dimension_semantics=semantics,
            vmem_limit_bytes=(32 if is_v7 else 64) * 1024 * 1024,
        ),
    )(x2d, t2d)

    sums = jnp.sum(partials, axis=(0, 2, 3))        # (3,)
    bce_sum, intersection, pt_sum = sums[0], sums[1], sums[2]

    bce_mean = -bce_sum / jnp.float32(n)            # single negate, in glue
    # TODO(synk): DiceLoss definition is not shown in the source file; using the
    # standard flattened formulation 1 - (2*I + s) / (sum(p) + sum(t) + s).
    dice = 1.0 - (2.0 * intersection + smooth) / (pt_sum + smooth)
    return bce_weight * bce_mean + dice_weight * dice


def dice_bce_loss(pred, target, *, bce_weight=0.5, dice_weight=0.5, smooth=1.0):
    if _IS_V7:
        try:
            return _dice_bce_impl(pred, target, bce_weight=bce_weight,
                                  dice_weight=dice_weight, smooth=smooth,
                                  core_parallel=True, is_v7=True)
        except Exception:
            pass  # fall back to the portable semantics below
    return _dice_bce_impl(pred, target, bce_weight=bce_weight,
                          dice_weight=dice_weight, smooth=smooth,
                          core_parallel=False, is_v7=_IS_V7)


def _reference(pred, target, bce_weight=0.5, dice_weight=0.5, smooth=1.0):
    p = pred.reshape(-1).astype(jnp.float32)
    t = target.reshape(-1).astype(jnp.float32)
    log_p = jnp.maximum(jnp.log(p), -100.0)
    log_1mp = jnp.maximum(jnp.log1p(-p), -100.0)
    bce = jnp.mean(-(t * log_p + (1.0 - t) * log_1mp))
    inter = jnp.sum(p * t)
    dice = 1.0 - (2.0 * inter + smooth) / (jnp.sum(p) + jnp.sum(t) + smooth)
    return bce_weight * bce + dice_weight * dice


if __name__ == "__main__":
    key = jax.random.PRNGKey(0)
    k1, k2 = jax.random.split(key)

    B, C, H, W = 2, 4, 16, 16  # NCHW, matches the PyTorch convention
    pred = jax.nn.sigmoid(jax.random.normal(k1, (B, C, H, W), jnp.float32))
    target = (jax.random.uniform(k2, (B, C, H, W)) > 0.5).astype(jnp.float32)

    loss = dice_bce_loss(pred, target, bce_weight=0.5, dice_weight=0.5)
    loss = jax.block_until_ready(loss)

    ref = _reference(pred, target)
    assert jnp.allclose(loss, ref, rtol=1e-5, atol=1e-5), (loss, ref)
    print("KERNEL_OK")
</pallas_src>

<mosaic_0001>
module attributes {stable_mosaic.version = 11 : i64} {
  func.func @_dice_bce_kernel(%arg0: i32, %arg1: i32, %arg2: memref<16x128xf32, #tpu.memory_space<vmem>>, %arg3: memref<16x128xf32, #tpu.memory_space<vmem>>, %arg4: memref<1x3x8x128xf32, #tpu.memory_space<vmem>>) attributes {dimension_semantics = [#tpu.dimension_semantics<parallel>, #tpu.dimension_semantics<arbitrary>], iteration_bounds = array<i64: 1, 1>, scalar_prefetch = 0 : i64, scratch_operands = 0 : i64, tpu.core_type = #tpu.core_type<tc>, window_params = [{transform_indices = @transform_0, window_bounds = array<i64: 16, 128>}, {transform_indices = @transform_1, window_bounds = array<i64: 16, 128>}, {transform_indices = @transform_2, window_bounds = array<i64: 1, 3, 8, 128>}]} {
    %c0_i32 = arith.constant 0 : i32
    %0 = arith.cmpi eq, %arg1, %c0_i32 : i32
    %1 = arith.extui %0 : i1 to i32
    %c0_i32_0 = arith.constant 0 : i32
    %2 = arith.cmpi ne, %1, %c0_i32_0 : i32
    scf.if %2 {
      %cst = arith.constant 0.000000e+00 : f32
      %13 = vector.broadcast %cst : f32 to vector<1x3x8x128xf32>
      %c0 = arith.constant 0 : index
      %c0_5 = arith.constant 0 : index
      %c0_6 = arith.constant 0 : index
      %c0_7 = arith.constant 0 : index
      %14 = vector.load %arg4[%c0, %c0_5, %c0_6, %c0_7] : memref<1x3x8x128xf32, #tpu.memory_space<vmem>>, vector<1x3x8x128xf32>
      tpu.vector_store %arg4[%c0, %c0_5, %c0_6, %c0_7], %13 {strides = array<i32>} : memref<1x3x8x128xf32, #tpu.memory_space<vmem>>, vector<1x3x8x128xf32>,
    } else {
    }
    %c1_i32 = arith.constant 1 : i32
    %3 = arith.muli %arg0, %c1_i32 : i32
    %4 = arith.addi %3, %arg1 : i32
    %c16_i32 = arith.constant 16 : i32
    %5 = arith.muli %4, %c16_i32 : i32
    %c16_i32_1 = arith.constant 16 : i32
    %6 = arith.addi %5, %c16_i32_1 : i32
    %c16_i32_2 = arith.constant 16 : i32
    %7 = arith.cmpi sle, %6, %c16_i32_2 : i32
    %8 = arith.extui %7 : i1 to i32
    %c0_i32_3 = arith.constant 0 : i32
    %9 = arith.cmpi ne, %8, %c0_i32_3 : i32
    scf.if %9 {
      %cst = arith.constant 0.000000e+00 : f32
      %13 = vector.broadcast %cst : f32 to vector<8x128xf32>
      %c0_i32_5 = arith.constant 0 : i32
      %c16_i32_6 = arith.constant 16 : i32
      %14 = arith.muli %c0_i32_5, %c16_i32_6 : i32
      %15 = tpu.assume_multiple %14, 16 : i32
      %16 = arith.index_cast %15 : i32 to index
      %c0 = arith.constant 0 : index
      %17 = vector.load %arg2[%16, %c0] : memref<16x128xf32, #tpu.memory_space<vmem>>, vector<16x128xf32>
      %18 = arith.index_cast %15 : i32 to index
      %c0_7 = arith.constant 0 : index
      %19 = vector.load %arg3[%18, %c0_7] : memref<16x128xf32, #tpu.memory_space<vmem>>, vector<16x128xf32>
      %20 = math.log %17 : vector<16x128xf32>
      %cst_8 = arith.constant -1.000000e+02 : f32
      %21 = vector.broadcast %cst_8 : f32 to vector<16x128xf32>
      %22 = arith.maximumf %20, %21 : vector<16x128xf32>
      %cst_9 = arith.constant 0.000000e+00 : f32
      %23 = vector.broadcast %cst_9 : f32 to vector<16x128xf32>
      %24 = arith.subf %23, %17 : vector<16x128xf32>
      %25 = math.log1p %24 : vector<16x128xf32>
      %cst_10 = arith.constant -1.000000e+02 : f32
      %26 = vector.broadcast %cst_10 : f32 to vector<16x128xf32>
      %27 = arith.maximumf %25, %26 : vector<16x128xf32>
      %28 = arith.subf %22, %27 : vector<16x128xf32>
      %29 = arith.mulf %19, %28 : vector<16x128xf32>
      %30 = arith.addf %27, %29 : vector<16x128xf32>
      %31 = vector.shape_cast %30 : vector<16x128xf32> to vector<2x8x128xf32>
      %cst_11 = arith.constant dense<0.000000e+00> : vector<8x128xf32>
      %32 = vector.multi_reduction <add>, %31, %cst_11 [0] : vector<2x8x128xf32> to vector<8x128xf32>
      %33 = arith.addf %13, %32 : vector<8x128xf32>
      %34 = arith.mulf %17, %19 : vector<16x128xf32>
      %35 = vector.shape_cast %34 : vector<16x128xf32> to vector<2x8x128xf32>
      %cst_12 = arith.constant dense<0.000000e+00> : vector<8x128xf32>
      %36 = vector.multi_reduction <add>, %35, %cst_12 [0] : vector<2x8x128xf32> to vector<8x128xf32>
      %37 = arith.addf %13, %36 : vector<8x128xf32>
      %38 = arith.addf %17, %19 : vector<16x128xf32>
      %39 = vector.shape_cast %38 : vector<16x128xf32> to vector<2x8x128xf32>
      %cst_13 = arith.constant dense<0.000000e+00> : vector<8x128xf32>
      %40 = vector.multi_reduction <add>, %39, %cst_13 [0] : vector<2x8x128xf32> to vector<8x128xf32>
      %41 = arith.addf %13, %40 : vector<8x128xf32>
      %c1_i32_14 = arith.constant 1 : i32
      %c0_15 = arith.constant 0 : index
      %c0_16 = arith.constant 0 : index
      %c0_17 = arith.constant 0 : index
      %c0_18 = arith.constant 0 : index
      %42 = vector.load %arg4[%c0_15, %c0_16, %c0_17, %c0_18] : memref<1x3x8x128xf32, #tpu.memory_space<vmem>>, vector<1x1x8x128xf32>
      %43 = vector.shape_cast %42 : vector<1x1x8x128xf32> to vector<8x128xf32>
      %44 = arith.addf %43, %33 : vector<8x128xf32>
      %c0_19 = arith.constant 0 : index
      %c0_20 = arith.constant 0 : index
      %c0_21 = arith.constant 0 : index
      %c0_22 = arith.constant 0 : index
      %45 = vector.load %arg4[%c0_19, %c0_20, %c0_21, %c0_22] : memref<1x3x8x128xf32, #tpu.memory_space<vmem>>, vector<1x1x8x128xf32>
      %46 = vector.shape_cast %45 : vector<1x1x8x128xf32> to vector<8x128xf32>
      %47 = vector.shape_cast %44 : vector<8x128xf32> to vector<1x1x8x128xf32>
      tpu.vector_store %arg4[%c0_19, %c0_20, %c0_21, %c0_22], %47 {strides = array<i32>} : memref<1x3x8x128xf32, #tpu.memory_space<vmem>>, vector<1x1x8x128xf32>,
      %c0_23 = arith.constant 0 : index
      %c1 = arith.constant 1 : index
      %c0_24 = arith.constant 0 : index
      %c0_25 = arith.constant 0 : index
      %48 = vector.load %arg4[%c0_23, %c1, %c0_24, %c0_25] : memref<1x3x8x128xf32, #tpu.memory_space<vmem>>, vector<1x1x8x128xf32>
      %49 = vector.shape_cast %48 : vector<1x1x8x128xf32> to vector<8x128xf32>
      %50 = arith.addf %49, %37 : vector<8x128xf32>
      %c0_26 = arith.constant 0 : index
      %c1_27 = arith.constant 1 : index
      %c0_28 = arith.constant 0 : index
      %c0_29 = arith.constant 0 : index
      %51 = vector.load %arg4[%c0_26, %c1_27, %c0_28, %c0_29] : memref<1x3x8x128xf32, #tpu.memory_space<vmem>>, vector<1x1x8x128xf32>
      %52 = vector.shape_cast %51 : vector<1x1x8x128xf32> to vector<8x128xf32>
      %53 = vector.shape_cast %50 : vector<8x128xf32> to vector<1x1x8x128xf32>
      tpu.vector_store %arg4[%c0_26, %c1_27, %c0_28, %c0_29], %53 {strides = array<i32>} : memref<1x3x8x128xf32, #tpu.memory_space<vmem>>, vector<1x1x8x128xf32>,
      %c0_30 = arith.constant 0 : index
      %c2 = arith.constant 2 : index
      %c0_31 = arith.constant 0 : index
      %c0_32 = arith.constant 0 : index
      %54 = vector.load %arg4[%c0_30, %c2, %c0_31, %c0_32] : memref<1x3x8x128xf32, #tpu.memory_space<vmem>>, vector<1x1x8x128xf32>
      %55 = vector.shape_cast %54 : vector<1x1x8x128xf32> to vector<8x128xf32>
      %56 = arith.addf %55, %41 : vector<8x128xf32>
      %c0_33 = arith.constant 0 : index
      %c2_34 = arith.constant 2 : index
      %c0_35 = arith.constant 0 : index
      %c0_36 = arith.constant 0 : index
      %57 = vector.load %arg4[%c0_33, %c2_34, %c0_35, %c0_36] : memref<1x3x8x128xf32, #tpu.memory_space<vmem>>, vector<1x1x8x128xf32>
      %58 = vector.shape_cast %57 : vector<1x1x8x128xf32> to vector<8x128xf32>
      %59 = vector.shape_cast %56 : vector<8x128xf32> to vector<1x1x8x128xf32>
      tpu.vector_store %arg4[%c0_33, %c2_34, %c0_35, %c0_36], %59 {strides = array<i32>} : memref<1x3x8x128xf32, #tpu.memory_space<vmem>>, vector<1x1x8x128xf32>,
    } else {
    }
    %true = arith.constant true
    %10 = arith.xori %7, %true : i1
    %11 = arith.extui %10 : i1 to i32
    %c0_i32_4 = arith.constant 0 : i32
    %12 = arith.cmpi ne, %11, %c0_i32_4 : i32
    scf.if %12 {
      %cst = arith.constant 0.000000e+00 : f32
      %13 = vector.broadcast %cst : f32 to vector<8x128xf32>
      %c0_i32_5 = arith.constant 0 : i32
      %c16_i32_6 = arith.constant 16 : i32
      %14 = arith.muli %c0_i32_5, %c16_i32_6 : i32
      %15 = tpu.assume_multiple %14, 16 : i32
      %16 = arith.index_cast %15 : i32 to index
      %c0 = arith.constant 0 : index
      %17 = vector.load %arg2[%16, %c0] : memref<16x128xf32, #tpu.memory_space<vmem>>, vector<16x128xf32>
      %18 = arith.index_cast %15 : i32 to index
      %c0_7 = arith.constant 0 : index
      %19 = vector.load %arg3[%18, %c0_7] : memref<16x128xf32, #tpu.memory_space<vmem>>, vector<16x128xf32>
      %c16_i32_8 = arith.constant 16 : i32
      %20 = arith.muli %c0_i32_5, %c16_i32_8 : i32
      %21 = arith.addi %5, %20 : i32
      %22 = tpu.iota {dimensions = array<i32: 0>} : vector<16x128xi32>
      %23 = vector.broadcast %21 : i32 to vector<16x128xi32>
      %24 = arith.addi %23, %22 : vector<16x128xi32>
      %c16_i32_9 = arith.constant 16 : i32
      %25 = vector.broadcast %c16_i32_9 : i32 to vector<16x128xi32>
      %26 = arith.cmpi slt, %24, %25 : vector<16x128xi32>
      %cst_10 = arith.constant 0.000000e+00 : f32
      %27 = vector.broadcast %cst_10 : f32 to vector<16x128xf32>
      %28 = arith.select %26, %17, %27 : vector<16x128xi1>, vector<16x128xf32>
      %cst_11 = arith.constant 0.000000e+00 : f32
      %29 = vector.broadcast %cst_11 : f32 to vector<16x128xf32>
      %30 = arith.select %26, %19, %29 : vector<16x128xi1>, vector<16x128xf32>
      %31 = math.log %28 : vector<16x128xf32>
      %cst_12 = arith.constant -1.000000e+02 : f32
      %32 = vector.broadcast %cst_12 : f32 to vector<16x128xf32>
      %33 = arith.maximumf %31, %32 : vector<16x128xf32>
      %cst_13 = arith.constant 0.000000e+00 : f32
      %34 = vector.broadcast %cst_13 : f32 to vector<16x128xf32>
      %35 = arith.subf %34, %28 : vector<16x128xf32>
      %36 = math.log1p %35 : vector<16x128xf32>
      %cst_14 = arith.constant -1.000000e+02 : f32
      %37 = vector.broadcast %cst_14 : f32 to vector<16x128xf32>
      %38 = arith.maximumf %36, %37 : vector<16x128xf32>
      %39 = arith.subf %33, %38 : vector<16x128xf32>
      %40 = arith.mulf %30, %39 : vector<16x128xf32>
      %41 = arith.addf %38, %40 : vector<16x128xf32>
      %42 = vector.shape_cast %41 : vector<16x128xf32> to vector<2x8x128xf32>
      %cst_15 = arith.constant dense<0.000000e+00> : vector<8x128xf32>
      %43 = vector.multi_reduction <add>, %42, %cst_15 [0] : vector<2x8x128xf32> to vector<8x128xf32>
      %44 = arith.addf %13, %43 : vector<8x128xf32>
      %45 = arith.mulf %28, %30 : vector<16x128xf32>
      %46 = vector.shape_cast %45 : vector<16x128xf32> to vector<2x8x128xf32>
      %cst_16 = arith.constant dense<0.000000e+00> : vector<8x128xf32>
      %47 = vector.multi_reduction <add>, %46, %cst_16 [0] : vector<2x8x128xf32> to vector<8x128xf32>
      %48 = arith.addf %13, %47 : vector<8x128xf32>
      %49 = arith.addf %28, %30 : vector<16x128xf32>
      %50 = vector.shape_cast %49 : vector<16x128xf32> to vector<2x8x128xf32>
      %cst_17 = arith.constant dense<0.000000e+00> : vector<8x128xf32>
      %51 = vector.multi_reduction <add>, %50, %cst_17 [0] : vector<2x8x128xf32> to vector<8x128xf32>
      %52 = arith.addf %13, %51 : vector<8x128xf32>
      %c1_i32_18 = arith.constant 1 : i32
      %c0_19 = arith.constant 0 : index
      %c0_20 = arith.constant 0 : index
      %c0_21 = arith.constant 0 : index
      %c0_22 = arith.constant 0 : index
      %53 = vector.load %arg4[%c0_19, %c0_20, %c0_21, %c0_22] : memref<1x3x8x128xf32, #tpu.memory_space<vmem>>, vector<1x1x8x128xf32>
      %54 = vector.shape_cast %53 : vector<1x1x8x128xf32> to vector<8x128xf32>
      %55 = arith.addf %54, %44 : vector<8x128xf32>
      %c0_23 = arith.constant 0 : index
      %c0_24 = arith.constant 0 : index
      %c0_25 = arith.constant 0 : index
      %c0_26 = arith.constant 0 : index
      %56 = vector.load %arg4[%c0_23, %c0_24, %c0_25, %c0_26] : memref<1x3x8x128xf32, #tpu.memory_space<vmem>>, vector<1x1x8x128xf32>
      %57 = vector.shape_cast %56 : vector<1x1x8x128xf32> to vector<8x128xf32>
      %58 = vector.shape_cast %55 : vector<8x128xf32> to vector<1x1x8x128xf32>
      tpu.vector_store %arg4[%c0_23, %c0_24, %c0_25, %c0_26], %58 {strides = array<i32>} : memref<1x3x8x128xf32, #tpu.memory_space<vmem>>, vector<1x1x8x128xf32>,
      %c0_27 = arith.constant 0 : index
      %c1 = arith.constant 1 : index
      %c0_28 = arith.constant 0 : index
      %c0_29 = arith.constant 0 : index
      %59 = vector.load %arg4[%c0_27, %c1, %c0_28, %c0_29] : memref<1x3x8x128xf32, #tpu.memory_space<vmem>>, vector<1x1x8x128xf32>
      %60 = vector.shape_cast %59 : vector<1x1x8x128xf32> to vector<8x128xf32>
      %61 = arith.addf %60, %48 : vector<8x128xf32>
      %c0_30 = arith.constant 0 : index
      %c1_31 = arith.constant 1 : index
      %c0_32 = arith.constant 0 : index
      %c0_33 = arith.constant 0 : index
      %62 = vector.load %arg4[%c0_30, %c1_31, %c0_32, %c0_33] : memref<1x3x8x128xf32, #tpu.memory_space<vmem>>, vector<1x1x8x128xf32>
      %63 = vector.shape_cast %62 : vector<1x1x8x128xf32> to vector<8x128xf32>
      %64 = vector.shape_cast %61 : vector<8x128xf32> to vector<1x1x8x128xf32>
      tpu.vector_store %arg4[%c0_30, %c1_31, %c0_32, %c0_33], %64 {strides = array<i32>} : memref<1x3x8x128xf32, #tpu.memory_space<vmem>>, vector<1x1x8x128xf32>,
      %c0_34 = arith.constant 0 : index
      %c2 = arith.constant 2 : index
      %c0_35 = arith.constant 0 : index
      %c0_36 = arith.constant 0 : index
      %65 = vector.load %arg4[%c0_34, %c2, %c0_35, %c0_36] : memref<1x3x8x128xf32, #tpu.memory_space<vmem>>, vector<1x1x8x128xf32>
      %66 = vector.shape_cast %65 : vector<1x1x8x128xf32> to vector<8x128xf32>
      %67 = arith.addf %66, %52 : vector<8x128xf32>
      %c0_37 = arith.constant 0 : index
      %c2_38 = arith.constant 2 : index
      %c0_39 = arith.constant 0 : index
      %c0_40 = arith.constant 0 : index
      %68 = vector.load %arg4[%c0_37, %c2_38, %c0_39, %c0_40] : memref<1x3x8x128xf32, #tpu.memory_space<vmem>>, vector<1x1x8x128xf32>
      %69 = vector.shape_cast %68 : vector<1x1x8x128xf32> to vector<8x128xf32>
      %70 = vector.shape_cast %67 : vector<8x128xf32> to vector<1x1x8x128xf32>
      tpu.vector_store %arg4[%c0_37, %c2_38, %c0_39, %c0_40], %70 {strides = array<i32>} : memref<1x3x8x128xf32, #tpu.memory_space<vmem>>, vector<1x1x8x128xf32>,
    } else {
    }
    return
  }
  func.func @transform_0(%arg0: i32, %arg1: i32) -> (i32, i32) {
    %c1_i32 = arith.constant 1 : i32
    %0 = arith.muli %arg0, %c1_i32 : i32
    %1 = arith.addi %0, %arg1 : i32
    %c0_i32 = arith.constant 0 : i32
    %2 = arith.minsi %1, %c0_i32 : i32
    %c0_i32_0 = arith.constant 0 : i32
    %c0_i32_1 = arith.constant 0 : i32
    return %2, %c0_i32_0 : i32, i32
  }
  func.func @transform_1(%arg0: i32, %arg1: i32) -> (i32, i32) {
    %c1_i32 = arith.constant 1 : i32
    %0 = arith.muli %arg0, %c1_i32 : i32
    %1 = arith.addi %0, %arg1 : i32
    %c0_i32 = arith.constant 0 : i32
    %2 = arith.minsi %1, %c0_i32 : i32
    %c0_i32_0 = arith.constant 0 : i32
    %c0_i32_1 = arith.constant 0 : i32
    return %2, %c0_i32_0 : i32, i32
  }
  func.func @transform_2(%arg0: i32, %arg1: i32) -> (i32, i32, i32, i32) {
    %c0_i32 = arith.constant 0 : i32
    %c0_i32_0 = arith.constant 0 : i32
    %c0_i32_1 = arith.constant 0 : i32
    %c0_i32_2 = arith.constant 0 : i32
    return %arg0, %c0_i32, %c0_i32_0, %c0_i32_1 : i32, i32, i32, i32
  }
}

</mosaic_0001>

<bundles_post_ra>
// kernel: _dice_bce_impl.1
= control target key start
LH: loop header
LB: loop body
LE: loop exit
PB: predicated region body
PF: predicated region fallthrough
CT: control target
= control target key end

     0   :  { %7 = vsyncpa [#allocation3], 0  ;;  %s381_s0 = inlined_call_operand.hbm [shape: f32[16,128], index: 0, kind: input, shape index: {}]   ;;  %s382_s1 = inlined_call_operand.hbm [shape: f32[16,128], index: 1, kind: input, shape index: {}]   ;;  %s383_s2 = inlined_call_operand.hbm [shape: f32[1,3,8,128], index: 2, kind: output, shape index: {}]  }
   0x1   :  { %8 = vsyncpa [#allocation6], 0 }
   0x2   :  { %9 = vsyncpa [#allocation4], 0  ;;  %s316_s9 = smov [#allocation2]   ;;  %s244_s13 = scalar_lea.hbm %s381_s0, 256 }
   0x3   :  { %s21_s10 = sshll.u32 %s316_s9, 4  ;;  %p245_p0 = scmp.ne.s32.totalorder %s381_s0, %s244_s13  ;;  %s22_s10 = int_to_ptr.vmem [resolvable:$true] %s21_s10 }
   0x4   :  { %p248_p1 = scmp.lt.u32.totalorder %s244_s13, %s381_s0 }
   0x6   :  { %p250_p2 = pnand %p248_p1, %p245_p0 }
   0x8   :  { %253 = shalt.err (!%p250_p2)
}
   0x9   :  { %s254_s18 = scalar_lea.vmem %s22_s10, 256  ;;  %p259_p4 = scmp.lt.s32.totalorder %s22_s10, %s22_s10 }
   0xa   :  { %p255_p3 = scmp.ne.s32.totalorder %s22_s10, %s254_s18  ;;  %p260_p5 = scmp.lt.s32.totalorder %s254_s18, %s254_s18 }
   0xc   :  { %p261_p6 = por %p260_p5, %p259_p4 }
   0xe   :  { %p262_p7 = pnand %p261_p6, %p255_p3 }
  0x10   :  { %265 = shalt.err (!%p262_p7)
}
  0x11   :  { %s317_s19 = smov 128   ;;  %s318_s20 = smov 8  }
  0x12   :  { %27 = dma.hbm_to_vmem [thread:$0]  %s381_s0, 256, %s22_s10, [#allocation3], %s317_s19, %s317_s19, %s318_s20  }
  0x13   :  { %s319_s23 = smov [#allocation5]   ;;  %s266_s27 = scalar_lea.hbm %s382_s1, 256 }
  0x14   :  { %s39_s24 = sshll.u32 %s319_s23, 4  ;;  %p267_p8 = scmp.ne.s32.totalorder %s382_s1, %s266_s27  ;;  %s40_s24 = int_to_ptr.vmem [resolvable:$true] %s39_s24 }
  0x15   :  { %p270_p9 = scmp.lt.u32.totalorder %s266_s27, %s382_s1 }
  0x17   :  { %p272_p10 = pnand %p270_p9, %p267_p8 }
  0x19   :  { %275 = shalt.err (!%p272_p10)
}
  0x1a   :  { %s276_s4 = scalar_lea.vmem %s40_s24, 256  ;;  %p281_p12 = scmp.lt.s32.totalorder %s40_s24, %s40_s24 }
  0x1b   :  { %p277_p11 = scmp.ne.s32.totalorder %s40_s24, %s276_s4  ;;  %p282_p13 = scmp.lt.s32.totalorder %s276_s4, %s276_s4 }
  0x1d   :  { %p283_p0 = por %p282_p13, %p281_p12 }
  0x1f   :  { %p284_p1 = pnand %p283_p0, %p277_p11 }
  0x21   :  { %287 = shalt.err (!%p284_p1)
}
  0x22   :  { %45 = dma.hbm_to_vmem [thread:$0]  %s382_s1, 256, %s40_s24, [#allocation6], %s317_s19, %s317_s19, %s318_s20  }
  0x23   :  { %310 = dma.done.wait [#allocation3], 256  }
  0x24   :  { %311 = vsyncadd [#allocation3], 4294967040 }
  0x25   :  { %312 = dma.done.wait [#allocation6], 256  }
  0x26   :  { %313 = vsyncadd [#allocation6], 4294967040  ;;  %v74_v0 = vld [vmem:[#allocation2] sm:$0xff]  ;;  %v75_v1 = vld [vmem:[#allocation2 + $0x8] sm:$0xff]  ;;  %s320_s1 = smov [#allocation7]  }
  0x27   :  { %v76_v2 = vld [vmem:[#allocation5] sm:$0xff]  ;;  %v77_v3 = vld [vmem:[#allocation5 + $0x8] sm:$0xff]  ;;  %236 = vlog2.f32 %v74_v0  ;;  %v84_v4 = vsub.f32 0.0, %v74_v0  ;;  %v85_v5 = vsub.f32 0.0, %v75_v1  ;;  %s213_s6 = sshll.u32 %s320_s1, 4  ;;  %s214_s6 = int_to_ptr.vmem [resolvable:$true] %s213_s6 }
  0x28   :  { %v114_v6 = vmul.f32 %v76_v2, %v74_v0  ;;  %238 = vlog2.f32 %v75_v1  ;;  %v115_v7 = vmul.f32 %v77_v3, %v75_v1  ;;  %v118_v8 = vadd.f32 %v76_v2, %v74_v0  ;;  %s288_s7 = scalar_lea.vmem %s214_s6, 384  ;;  %p293_p3 = scmp.lt.s32.totalorder %s214_s6, %s214_s6 }
  0x29   :  { %v119_v9 = vadd.f32 %v77_v3, %v75_v1  ;;  %v86_v10 = vadd.f32 1.0, %v84_v4  ;;  %v95_v11 = vadd.f32 1.0, %v85_v5  ;;  %v89_v14 = vmul.f32 -0.5, %v84_v4  ;;  %p289_p2 = scmp.ne.s32.totalorder %s214_s6, %s288_s7  ;;  %p294_p4 = scmp.lt.s32.totalorder %s288_s7, %s288_s7 }
  0x2a   :  { %v116_v12 = vadd.f32 %v115_v7, %v114_v6  ;;  %v98_v15 = vmul.f32 -0.5, %v85_v5  ;;  %v92_v18 = vand.u32 2147483647, %v84_v4  ;;  %v101_v21 = vand.u32 2147483647, %v85_v5 }
  0x2b   :  { %v120_v13 = vadd.f32 %v119_v9, %v118_v8  ;;  %240 = vlog2.f32 %v86_v10  ;;  %v90_v16 = vadd.f32 1.0, %v89_v14  ;;  %p295_p5 = por %p294_p4, %p293_p3 }
  0x2c   :  { %242 = vlog2.f32 %v95_v11  ;;  %128 = vst [vmem:[#allocation7 + $0x8] sm:$0xff] %v116_v12  ;;  %v99_v19 = vadd.f32 1.0, %v98_v15  ;;  %vm93_vm0 = vcmp.lt.f32.partialorder %v92_v18, 0.0004427343  ;;  %vm102_vm1 = vcmp.lt.f32.partialorder %v101_v21, 0.0004427343 }
  0x2d   :  { %132 = vst [vmem:[#allocation7 + $0x10] sm:$0xff] %v120_v13  ;;  %v91_v24 = vmul.f32 %v90_v16, %v84_v4  ;;  %p296_p6 = pnand %p295_p5, %p289_p2 }
  0x2e   :  { %v100_v26 = vmul.f32 %v99_v19, %v85_v5 }
  0x31   :  { %v237_v17 = vpop.eup %236 }
  0x32   :  { %v239_v20 = vpop.eup %238  ;;  %v79_v22 = vmul.f32 0.6931472, %v237_v17 }
  0x33   :  { %v81_v23 = vmul.f32 0.6931472, %v239_v20 }
  0x34   :  { %v82_v29 = vmax.f32 %v79_v22, -100.0 }
  0x35   :  { %v241_v25 = vpop.eup %240  ;;  %v83_v31 = vmax.f32 %v81_v23, -100.0 }
  0x36   :  { %v243_v27 = vpop.eup %242  ;;  %v88_v28 = vmul.f32 0.6931472, %v241_v25 }
  0x37   :  { %v97_v30 = vmul.f32 0.6931472, %v243_v27 }
  0x38   :  { %v94_v32 = vsel %vm93_vm0, %v91_v24, %v88_v28 }
  0x39   :  { %v103_v33 = vsel %vm102_vm1, %v100_v26, %v97_v30  ;;  %v104_v34 = vmax.f32 %v94_v32, -100.0 }
  0x3a   :  { %v105_v35 = vmax.f32 %v103_v33, -100.0 }
  0x3b   :  { %v106_v36 = vsub.f32 %v82_v29, %v104_v34 }
  0x3c   :  { %v107_v37 = vsub.f32 %v83_v31, %v105_v35 }
  0x3d   :  { %v108_v38 = vmul.f32 %v106_v36, %v76_v2 }
  0x3e   :  { %v109_v39 = vmul.f32 %v107_v37, %v77_v3 }
  0x3f   :  { %v110_v40 = vadd.f32 %v108_v38, %v104_v34 }
  0x40   :  { %v111_v41 = vadd.f32 %v109_v39, %v105_v35 }
  0x42   :  { %v112_v42 = vadd.f32 %v111_v41, %v110_v40 }
  0x44   :  { %124 = vst [vmem:[#allocation7] sm:$0xff] %v112_v42 }
  0x45   :  { %299 = shalt.err (!%p296_p6)
}
  0x46   :  { %s300_s10 = scalar_lea.hbm %s383_s2, 384 }
  0x47   :  { %p301_p7 = scmp.ne.s32.totalorder %s383_s2, %s300_s10  ;;  %p304_p8 = scmp.lt.u32.totalorder %s300_s10, %s383_s2 }
  0x49   :  { %p306_p9 = pnand %p304_p8, %p301_p7 }
  0x4b   :  { %309 = shalt.err (!%p306_p9)
}
  0x4c   :  { %219 = dma.vmem_to_hbm [thread:$0]  %s214_s6, 384, %s383_s2, [#allocation4], %s317_s19, %s317_s19, %s318_s20  }
  0x4d   :  { %314 = dma.done.wait [#allocation4], 384  }
  0x4e   :  { %315 = vsyncadd [#allocation4], 4294966912 }
  0x4f   :  { %223 = vsyncpa [#allocation3], 1 }
  0x50   :  { %224 = vsyncpa [#allocation6], 1 }
  0x51   :  { %225 = vsyncpa [#allocation4], 1 }

</bundles_post_ra>
